<compile_context>
chip_gen: v6e
topology: v6e:2x2x1
jax: 0.10.0
libtpu: 0.0.40
codegen_flags: <defaults>
</compile_context>

<pallas_src>
import functools

import jax
import jax.numpy as jnp
from jax import lax
from jax.experimental import pallas as pl
from jax.experimental.pallas import tpu as pltpu

_LANES = 128
_VMEM_LIMIT_BYTES = 32 * 1024 * 1024     # within scoped VMEM on v5e/v6e/v7x
_INPUT_VMEM_BUDGET = 24 * 1024 * 1024    # ~75% headroom for 2x double-buffered inputs
_MAX_BLOCK_D = 8192


def _dice_partial_kernel(in_ref, tgt_ref, inter_ref, denom_ref, *,
                         block_d, d_rows, needs_mask):
    """Accumulate lane-dense (row_block, 128) partials of sum(x*t) and sum(x+t)."""
    k = pl.program_id(1)

    @pl.when(k == 0)
    def _init():
        inter_ref[...] = jnp.zeros(inter_ref.shape, inter_ref.dtype)
        denom_ref[...] = jnp.zeros(denom_ref.shape, denom_ref.dtype)

    rows = inter_ref.shape[0]
    num_full = block_d // _LANES
    rem = block_d % _LANES

    if needs_mask:
        lane = lax.broadcasted_iota(jnp.int32, (rows, _LANES), 1)
        base = k * block_d

    # 128-lane strided accumulation: pure VPU adds, unmasked lane-dense stores.
    for c in range(num_full):
        sl = slice(c * _LANES, (c + 1) * _LANES)
        x = in_ref[:, sl].astype(jnp.float32)
        t = tgt_ref[:, sl].astype(jnp.float32)
        if needs_mask:
            valid = lane < (d_rows - (base + c * _LANES))
            x = jnp.where(valid, x, 0.0)
            t = jnp.where(valid, t, 0.0)
        inter_ref[...] += x * t
        denom_ref[...] += x + t

    if rem:
        # Ragged tail only occurs when the whole row fits in a single D block
        # (block_d == d_rows), so there is no out-of-bounds data to mask.
        sl = slice(num_full * _LANES, num_full * _LANES + rem)
        x = in_ref[:, sl].astype(jnp.float32)
        t = tgt_ref[:, sl].astype(jnp.float32)
        inter_ref[:, 0:1] += jnp.sum(x * t, axis=1, keepdims=True)
        denom_ref[:, 0:1] += jnp.sum(x + t, axis=1, keepdims=True)


def _choose_fold(n, d):
    """Fold each sample row into R pseudo-rows so small batches fill sublanes."""
    if n >= 8:
        return 1
    for r in (8, 4, 2):
        if d % r == 0:
            return r
    return 1


@jax.jit
def dice_loss(inp, tgt):
    n = tgt.shape[0]
    smooth = jnp.float32(1.0)

    # torch semantics: target.float(); keep floating dtypes native (cast
    # in-kernel), only promote integer/bool targets here.
    if not jnp.issubdtype(tgt.dtype, jnp.floating):
        tgt = tgt.astype(jnp.float32)
    if not jnp.issubdtype(inp.dtype, jnp.floating):
        inp = inp.astype(jnp.float32)

    d = 1
    for s in inp.shape[1:]:
        d *= s

    fold = _choose_fold(n, d)
    rows = n * fold
    d_rows = d // fold

    inp_flat = inp.reshape(rows, d_rows)   # metadata-only reshape, no copy
    tgt_flat = tgt.reshape(rows, d_rows)

    # Sublane granularity required by the narrowest input dtype.
    min_sub = 8
    for a in (inp_flat, tgt_flat):
        if a.dtype.itemsize == 2:
            min_sub = max(min_sub, 16)
        elif a.dtype.itemsize == 1:
            min_sub = max(min_sub, 32)

    # Leading row-block axis: 2 blocks lets the v7x megacore split the stream.
    num_row_blocks = 2 if rows % (2 * min_sub) == 0 else 1
    row_block = rows // num_row_blocks

    # Largest lane tile that fits the double-buffered input VMEM budget.
    bytes_per_col = 2 * row_block * (inp_flat.dtype.itemsize
                                     + tgt_flat.dtype.itemsize)
    block_d = _INPUT_VMEM_BUDGET // max(bytes_per_col, 1)
    block_d = min(max((block_d // _LANES) * _LANES, _LANES), _MAX_BLOCK_D)
    if block_d >= d_rows:
        block_d = d_rows        # single D step; full-extent block (any width legal)
        num_d_blocks = 1
        needs_mask = False
    else:
        num_d_blocks = -(-d_rows // block_d)
        needs_mask = (d_rows % block_d) != 0

    kernel = functools.partial(
        _dice_partial_kernel,
        block_d=block_d, d_rows=d_rows, needs_mask=needs_mask)

    out_shape = (
        jax.ShapeDtypeStruct((rows, _LANES), jnp.float32),  # intersection partials
        jax.ShapeDtypeStruct((rows, _LANES), jnp.float32),  # (x + t) partials
    )
    cost = pl.CostEstimate(
        flops=3 * rows * d_rows,
        transcendentals=0,
        bytes_accessed=rows * d_rows * (inp_flat.dtype.itemsize
                                        + tgt_flat.dtype.itemsize)
        + 2 * rows * _LANES * 4,
    )

    inter_p, denom_p = pl.pallas_call(
        kernel,
        out_shape=out_shape,
        grid_spec=pltpu.PrefetchScalarGridSpec(
            num_scalar_prefetch=0,
            grid=(num_row_blocks, num_d_blocks),
            in_specs=[
                pl.BlockSpec((row_block, block_d), lambda i, k: (i, k)),
                pl.BlockSpec((row_block, block_d), lambda i, k: (i, k)),
            ],
            out_specs=(
                pl.BlockSpec((row_block, _LANES), lambda i, k: (i, 0)),
                pl.BlockSpec((row_block, _LANES), lambda i, k: (i, 0)),
            ),
        ),
        compiler_params=pltpu.CompilerParams(
            dimension_semantics=("parallel", "arbitrary"),
            vmem_limit_bytes=_VMEM_LIMIT_BYTES,
        ),
        cost_estimate=cost,
    )(inp_flat, tgt_flat)

    # Tiny epilogue on (rows, 128) partials: per-sample sums + dice formula.
    inter = inter_p.reshape(n, -1).sum(axis=1)
    denom = denom_p.reshape(n, -1).sum(axis=1)
    per_sample = 2.0 * (inter + smooth) / (denom + smooth)
    return jnp.float32(1.0) - per_sample.sum() / jnp.float32(n)


def _dice_loss_ref(inp, tgt):
    n = tgt.shape[0]
    smooth = 1.0
    x = inp.reshape(n, -1).astype(jnp.float32)
    t = tgt.reshape(n, -1).astype(jnp.float32)
    inter = (x * t).sum(axis=1)
    per = 2.0 * (inter + smooth) / (x.sum(axis=1) + t.sum(axis=1) + smooth)
    return 1.0 - per.sum() / n


if __name__ == "__main__":
    key = jax.random.PRNGKey(0)
    k_in, k_tg = jax.random.split(key)

    # Segmentation-style forward: (N, C, H, W)
    N, C, H, W = 2, 4, 16, 16
    inp = jax.nn.sigmoid(jax.random.normal(k_in, (N, C, H, W), dtype=jnp.float32))
    tgt = (jax.random.uniform(k_tg, (N, C, H, W)) > 0.5).astype(jnp.float32)

    loss = dice_loss(inp, tgt)
    jax.block_until_ready(loss)

    ref = _dice_loss_ref(inp, tgt)
    assert jnp.allclose(loss, ref, atol=1e-5, rtol=1e-5), (loss, ref)

    print("KERNEL_OK")
</pallas_src>

<mosaic_0001>
module attributes {stable_mosaic.version = 11 : i64} {
  func.func @_dice_partial_kernel(%arg0: i32, %arg1: i32, %arg2: memref<8x128xf32, #tpu.memory_space<vmem>>, %arg3: memref<8x128xf32, #tpu.memory_space<vmem>>, %arg4: memref<8x128xf32, #tpu.memory_space<vmem>>, %arg5: memref<8x128xf32, #tpu.memory_space<vmem>>) attributes {dimension_semantics = [#tpu.dimension_semantics<parallel>, #tpu.dimension_semantics<arbitrary>], iteration_bounds = array<i64: 2, 1>, scalar_prefetch = 0 : i64, scratch_operands = 0 : i64, tpu.core_type = #tpu.core_type<tc>, window_params = [{transform_indices = @transform_0, window_bounds = array<i64: 8, 128>}, {transform_indices = @transform_1, window_bounds = array<i64: 8, 128>}, {transform_indices = @transform_2, window_bounds = array<i64: 8, 128>}, {transform_indices = @transform_3, window_bounds = array<i64: 8, 128>}]} {
    %c0_i32 = arith.constant 0 : i32
    %0 = arith.cmpi eq, %arg1, %c0_i32 : i32
    %1 = arith.extui %0 : i1 to i32
    %c0_i32_0 = arith.constant 0 : i32
    %2 = arith.cmpi ne, %1, %c0_i32_0 : i32
    scf.if %2 {
      %cst = arith.constant 0.000000e+00 : f32
      %13 = vector.broadcast %cst : f32 to vector<8x128xf32>
      %c0_12 = arith.constant 0 : index
      %c0_13 = arith.constant 0 : index
      %14 = vector.load %arg4[%c0_12, %c0_13] : memref<8x128xf32, #tpu.memory_space<vmem>>, vector<8x128xf32>
      tpu.vector_store %arg4[%c0_12, %c0_13], %13 {strides = array<i32>} : memref<8x128xf32, #tpu.memory_space<vmem>>, vector<8x128xf32>,
      %cst_14 = arith.constant 0.000000e+00 : f32
      %15 = vector.broadcast %cst_14 : f32 to vector<8x128xf32>
      %c0_15 = arith.constant 0 : index
      %c0_16 = arith.constant 0 : index
      %16 = vector.load %arg5[%c0_15, %c0_16] : memref<8x128xf32, #tpu.memory_space<vmem>>, vector<8x128xf32>
      tpu.vector_store %arg5[%c0_15, %c0_16], %15 {strides = array<i32>} : memref<8x128xf32, #tpu.memory_space<vmem>>, vector<8x128xf32>,
    } else {
    }
    %c0 = arith.constant 0 : index
    %c0_1 = arith.constant 0 : index
    %3 = vector.load %arg2[%c0, %c0_1] : memref<8x128xf32, #tpu.memory_space<vmem>>, vector<8x128xf32>
    %c0_2 = arith.constant 0 : index
    %c0_3 = arith.constant 0 : index
    %4 = vector.load %arg3[%c0_2, %c0_3] : memref<8x128xf32, #tpu.memory_space<vmem>>, vector<8x128xf32>
    %c0_4 = arith.constant 0 : index
    %c0_5 = arith.constant 0 : index
    %5 = vector.load %arg4[%c0_4, %c0_5] : memref<8x128xf32, #tpu.memory_space<vmem>>, vector<8x128xf32>
    %6 = arith.mulf %3, %4 : vector<8x128xf32>
    %7 = arith.addf %5, %6 : vector<8x128xf32>
    %c0_6 = arith.constant 0 : index
    %c0_7 = arith.constant 0 : index
    %8 = vector.load %arg4[%c0_6, %c0_7] : memref<8x128xf32, #tpu.memory_space<vmem>>, vector<8x128xf32>
    tpu.vector_store %arg4[%c0_6, %c0_7], %7 {strides = array<i32>} : memref<8x128xf32, #tpu.memory_space<vmem>>, vector<8x128xf32>,
    %c0_8 = arith.constant 0 : index
    %c0_9 = arith.constant 0 : index
    %9 = vector.load %arg5[%c0_8, %c0_9] : memref<8x128xf32, #tpu.memory_space<vmem>>, vector<8x128xf32>
    %10 = arith.addf %3, %4 : vector<8x128xf32>
    %11 = arith.addf %9, %10 : vector<8x128xf32>
    %c0_10 = arith.constant 0 : index
    %c0_11 = arith.constant 0 : index
    %12 = vector.load %arg5[%c0_10, %c0_11] : memref<8x128xf32, #tpu.memory_space<vmem>>, vector<8x128xf32>
    tpu.vector_store %arg5[%c0_10, %c0_11], %11 {strides = array<i32>} : memref<8x128xf32, #tpu.memory_space<vmem>>, vector<8x128xf32>,
    return
  }
  func.func @transform_0(%arg0: i32, %arg1: i32) -> (i32, i32) {
    %c0_i32 = arith.constant 0 : i32
    return %arg0, %arg1 : i32, i32
  }
  func.func @transform_1(%arg0: i32, %arg1: i32) -> (i32, i32) {
    %c0_i32 = arith.constant 0 : i32
    return %arg0, %arg1 : i32, i32
  }
  func.func @transform_2(%arg0: i32, %arg1: i32) -> (i32, i32) {
    %c0_i32 = arith.constant 0 : i32
    %c0_i32_0 = arith.constant 0 : i32
    return %arg0, %c0_i32 : i32, i32
  }
  func.func @transform_3(%arg0: i32, %arg1: i32) -> (i32, i32) {
    %c0_i32 = arith.constant 0 : i32
    %c0_i32_0 = arith.constant 0 : i32
    return %arg0, %c0_i32 : i32, i32
  }
}

</mosaic_0001>

<bundles_post_ra>
// kernel: dice_loss.1
= control target key start
LH: loop header
LB: loop body
LE: loop exit
PB: predicated region body
PF: predicated region fallthrough
CT: control target
= control target key end

     0   :  { %s434_s12 = smov 0   ;;  %s436_s13 = smov 0   ;;  %s461_s0 = inlined_call_operand.vmem [shape: f32[16,128], index: 0, kind: input, shape index: {}]   ;;  %s462_s1 = inlined_call_operand.vmem [shape: f32[16,128], index: 1, kind: input, shape index: {}]   ;;  %s463_s2 = inlined_call_operand.vmem [shape: f32[16,128], index: 2, kind: output, shape index: {0}]   ;;  %s464_s3 = inlined_call_operand.vmem [shape: f32[16,128], index: 3, kind: output, shape index: {1}]  }
   0x1   :  { %s438_s14 = smov 0  }
   0x2 LB: > { %s26_s15 = sadd.s32 1, %s408_s13  ;;  %p358_p0 = scmp.ge.s32.totalorder %s412_s14, 1  ;;  %s412_s14 = sphi %s438_s14, %s14_s14   ;;  %s408_s13 = sphi %s436_s13, %s466_s13   ;;  %s404_s12 = sphi %s434_s12, %s465_s12  }
   0x3   : > { %p28_p1 = scmp.ge.s32.totalorder %s26_s15, 2  ;;  %p170_p2 = scmp.lt.s32.totalorder %s412_s14, 3 }
   0x5   : > { %s468_s15 = smov (%p28_p1, %s26_s15), 0  ;;  %p171_p3 = pnand %p358_p0, %p170_p2 }
   0x6   : > { %p206_p4 = scmp.lt.s32.totalorder (!%p171_p3), %s404_s12, 1 }
   0x7   : > { %174 = sbr.rel (%p171_p3) target bundleno = 20 (0x14), region = 28 }
   0xc   : > { %s470_s12 = smov (!%p206_p4, %s404_s12), 1 }
   0xd   : > { %s359_s16 = sshll.u32 %s470_s12, 3 }
   0xe   : > { %s212_s19 = scalar_lea.vmem %s461_s0, %s359_s16  ;;  %s219_s22 = scalar_lea.vmem %s462_s1, %s359_s16 }
   0xf   : > { %v234_v0 = vld [vmem:[%s212_s19] sm:$0xff]  ;;  %s223_s25 = scalar_lea.vmem %s463_s2, %s359_s16  ;;  %s227_s28 = scalar_lea.vmem %s464_s3, %s359_s16 }
  0x10   : > { %v235_v1 = vld [vmem:[%s219_s22] sm:$0xff] }
  0x11   : > { %v237_v2 = vmul.f32 %v235_v1, %v234_v0  ;;  %v241_v3 = vadd.f32 %v235_v1, %v234_v0 }
  0x13   : > { %239 = vst [vmem:[%s223_s25] sm:$0xff] %v237_v2  ;;  %243 = vst [vmem:[%s227_s28] sm:$0xff] %v241_v3 }
  0x14 PF: > { %s14_s14 = sadd.s32 1, %s412_s14   ;;  %s465_s12 = smov %s408_s13 }
  0x15   : > { %p11_p5 = scmp.ge.s32.totalorder %s14_s14, 4   ;;  %s466_s13 = smov %s468_s15 }
  0x17   :  { %13 = sbr.rel (!%p11_p5) target bundleno = 2 (0x2), region = 77 }

</bundles_post_ra>
